<compile_context>
chip_gen: v7x
topology: tpu7x:2x2x1
jax: 0.10.0
libtpu: 0.0.40
codegen_flags: <defaults>
</compile_context>

<pallas_src>
import functools

import jax
import jax.numpy as jnp
from jax.experimental import pallas as pl
from jax.experimental.pallas import tpu as pltpu

EPS = 1e-5  # nn.BatchNorm2d default eps


def _round_up(x, m):
    return (x + m - 1) // m * m


def _vmem_limits():
    """Generation-aware VMEM limit / tile budget (v5e,v6e: 128 MiB phys; v7x: 64 MiB)."""
    phys = 64 * 1024 * 1024  # conservative fallback (v7x per-TensorCore)
    try:
        phys = int(pltpu.get_tpu_info().vmem_capacity_bytes)
    except Exception:
        pass
    limit = max(32 * 1024 * 1024, min((phys * 3) // 4, 100 * 1024 * 1024))
    budget = (limit * 3) // 4
    return limit, budget


def _pick_tile_m(M, Cin, Cp, out_bytes, budget):
    """Largest 128-aligned M tile whose pipelined buffers fit the VMEM budget."""
    # TM-independent blocks: double-buffered per-tap weight, stats block, scale/bias.
    fixed = 2 * (Cin * Cp * 2) + 2 * (8 * Cp * 4) + 4 * (Cp * 4)
    # Per-output-row bytes (conservative union of pass-1 and pass-2 footprints).
    per_row = (2 * Cin * 2          # tap block, 2 buffers, bf16
               + 2 * Cp * 2         # bf16 y block (out of pass 1 / into pass 2), 2 buffers
               + Cp * 4             # f32 accumulator scratch (single buffer)
               + 2 * Cp * out_bytes)  # pass-2 output block, 2 buffers
    tm = (budget - fixed) // max(per_row, 1)
    tm = max(128, min(2048, (tm // 128) * 128))
    m128 = _round_up(M, 128)
    tm = min(tm, m128)
    # v7x megacore: keep at least two M tiles when the problem is big enough so the
    # "parallel" M axis actually shards across both TensorCores.
    if m128 >= 256 and tm >= m128:
        tm = _round_up(m128 // 2, 128)
    return tm


# ---------------------------------------------------------------------------
# Pass 1: per-tap accumulating matmul + fused per-tile per-channel sum / sum-sq
#   grid = (num_m_tiles, 9 taps); tap axis is the (arbitrary) reduction axis.
# ---------------------------------------------------------------------------
def _conv_stats_kernel(tap_ref, w_ref, y_ref, stats_ref, acc_ref, *, small_k):
    t = pl.program_id(1)

    @pl.when(t == 0)
    def _init():
        acc_ref[...] = jnp.zeros_like(acc_ref)

    tap = tap_ref[0]   # [TM, Cin] bf16
    w = w_ref[0]       # [Cin, Cp] bf16

    if small_k:
        # Tiny contraction: an MXU tile would be >90% zero padding, so do the
        # multiply-accumulate on the VPU (rank-1 updates, fully lane-dense).
        part = jnp.zeros((tap.shape[0], w.shape[1]), jnp.float32)
        for c in range(tap.shape[1]):
            part += tap[:, c:c + 1].astype(jnp.float32) * w[c:c + 1, :].astype(jnp.float32)
        acc_ref[...] += part
    else:
        acc_ref[...] += jnp.dot(tap, w, preferred_element_type=jnp.float32)

    @pl.when(t == pl.num_programs(1) - 1)
    def _finalize():
        y = acc_ref[...]                          # f32 accumulator
        y_ref[...] = y.astype(y_ref.dtype)        # bf16 activation to HBM
        s = jnp.sum(y, axis=0, keepdims=True)     # [1, Cp]  per-channel sum
        ss = jnp.sum(y * y, axis=0, keepdims=True)  # [1, Cp]  per-channel sum of squares
        stats_ref[...] = jnp.zeros_like(stats_ref)
        stats_ref[0:1, :] = s
        stats_ref[1:2, :] = ss


# ---------------------------------------------------------------------------
# Pass 2: per-tile affine BatchNorm (+ optional ReLU), f32 math on bf16 y.
# ---------------------------------------------------------------------------
def _bn_relu_kernel(y_ref, scale_ref, bias_ref, out_ref, *, use_relu):
    y = y_ref[...].astype(jnp.float32)
    out = y * scale_ref[...] + bias_ref[...]
    if use_relu:
        out = jnp.maximum(out, 0.0)
    out_ref[...] = out.astype(out_ref.dtype)


def strided_conv(x_nchw, weight_oihw, gamma, beta, use_relu=False, out_dtype=None):
    """Forward of StridedConv. x: [N,Cin,H,W], weight: [Cout,Cin,3,3] -> [N,Cout,Ho,Wo]."""
    N, Cin, H, W = x_nchw.shape
    Cout = weight_oihw.shape[0]
    Ho = (H + 2 - 3) // 2 + 1
    Wo = (W + 2 - 3) // 2 + 1
    M = N * Ho * Wo

    out_dtype = x_nchw.dtype if out_dtype is None else out_dtype
    obytes = jnp.dtype(out_dtype).itemsize

    Cp = _round_up(Cout, 128)
    vmem_limit, budget = _vmem_limits()
    TM = _pick_tile_m(M, Cin, Cp, obytes, budget)
    Mp = _round_up(M, TM)
    num_tiles = Mp // TM
    small_k = Cin < 32

    # ---- glue: NCHW -> NHWC bf16, spatial zero-pad, 9 per-tap strided views ----
    # No concatenated/K-padded im2col: taps stay [9, M, Cin] (bf16, un-padded Cin).
    # TODO(synk): a fully HBM-intermediate-free variant would DMA strided windows of
    # the padded NHWC tensor inside the kernel (manual make_async_copy); the per-tap
    # bf16 slabs already remove the Kp padding blow-up and halve the bytes vs f32.
    x = jnp.transpose(x_nchw, (0, 2, 3, 1)).astype(jnp.bfloat16)        # [N,H,W,Cin]
    xp = jnp.pad(x, ((0, 0), (1, 1), (1, 1), (0, 0)))                   # [N,H+2,W+2,Cin]
    taps = jnp.stack([xp[:, kh:kh + 2 * Ho:2, kw:kw + 2 * Wo:2, :]
                      for kh in range(3) for kw in range(3)], axis=0)   # [9,N,Ho,Wo,Cin]
    taps = taps.reshape(9, M, Cin)
    if Mp != M:
        taps = jnp.pad(taps, ((0, 0), (0, Mp - M), (0, 0)))             # zero rows are inert

    # weight [Cout,Cin,3,3] -> [kh,kw,Cin,Cout] -> [9, Cin, Cout] -> pad Cout to Cp
    w = jnp.transpose(weight_oihw, (2, 3, 1, 0)).reshape(9, Cin, Cout).astype(jnp.bfloat16)
    if Cp != Cout:
        w = jnp.pad(w, ((0, 0), (0, 0), (0, Cp - Cout)))

    # ---- pass 1: per-tap accumulating matmul + fused per-tile (sum, sumsq) ----
    ce1 = pl.CostEstimate(
        flops=2 * Mp * Cp * Cin * 9, transcendentals=0,
        bytes_accessed=(9 * Mp * Cin * 2 + num_tiles * 9 * Cin * Cp * 2
                        + Mp * Cp * 2 + num_tiles * 8 * Cp * 4))
    y, stats = pl.pallas_call(
        functools.partial(_conv_stats_kernel, small_k=small_k),
        out_shape=(jax.ShapeDtypeStruct((Mp, Cp), jnp.bfloat16),
                   jax.ShapeDtypeStruct((num_tiles * 8, Cp), jnp.float32)),
        grid=(num_tiles, 9),
        in_specs=[pl.BlockSpec((1, TM, Cin), lambda i, t: (t, i, 0)),
                  pl.BlockSpec((1, Cin, Cp), lambda i, t: (t, 0, 0))],
        out_specs=(pl.BlockSpec((TM, Cp), lambda i, t: (i, 0)),
                   pl.BlockSpec((8, Cp), lambda i, t: (i, 0))),
        scratch_shapes=[pltpu.VMEM((TM, Cp), jnp.float32)],
        compiler_params=pltpu.CompilerParams(
            dimension_semantics=("parallel", "arbitrary"),
            vmem_limit_bytes=vmem_limit),
        cost_estimate=ce1,
    )(taps, w)

    # ---- tiny cross-tile reduction + BN scale/bias (training-mode biased batch stats) ----
    # TODO(synk): nn.BatchNorm2d also updates running_mean/running_var buffers in training
    # mode; the forward output does not depend on them, so they are not computed here.
    # NOTE: var = E[y^2]-E[y]^2 in f32 can cancel for huge M with large |mean|; fine here.
    totals = jnp.sum(stats.reshape(num_tiles, 8, Cp), axis=0)           # [8, Cp]
    mean = totals[0] / M                                                # true M (padded rows add 0)
    var = jnp.maximum(totals[1] / M - mean * mean, 0.0)
    inv = jax.lax.rsqrt(var + EPS)
    gamma_p = jnp.pad(gamma.astype(jnp.float32), (0, Cp - Cout))
    beta_p = jnp.pad(beta.astype(jnp.float32), (0, Cp - Cout))
    scale = (gamma_p * inv).reshape(1, Cp)
    bias = (beta_p - mean * gamma_p * inv).reshape(1, Cp)

    # ---- pass 2: tiled affine normalize (+ ReLU), lane-dense stores ----
    # TODO(synk): this pure elementwise pass is best fused into whatever consumes the
    # conv output; kept standalone here, with the output emitted in the consumer dtype.
    ce2 = pl.CostEstimate(flops=3 * Mp * Cp, transcendentals=0,
                          bytes_accessed=Mp * Cp * 2 + Mp * Cp * obytes + 2 * Cp * 4)
    out_mat = pl.pallas_call(
        functools.partial(_bn_relu_kernel, use_relu=use_relu),
        out_shape=jax.ShapeDtypeStruct((Mp, Cp), out_dtype),
        grid=(num_tiles,),
        in_specs=[pl.BlockSpec((TM, Cp), lambda i: (i, 0)),
                  pl.BlockSpec((1, Cp), lambda i: (0, 0)),
                  pl.BlockSpec((1, Cp), lambda i: (0, 0))],
        out_specs=pl.BlockSpec((TM, Cp), lambda i: (i, 0)),
        compiler_params=pltpu.CompilerParams(
            dimension_semantics=("parallel",),
            vmem_limit_bytes=vmem_limit),
        cost_estimate=ce2,
    )(y, scale, bias)

    out = out_mat[:M, :Cout].reshape(N, Ho, Wo, Cout)
    # TODO(synk): consumers that accept NHWC can skip this final layout transpose.
    return jnp.transpose(out, (0, 3, 1, 2))


def _reference(x_nchw, weight_oihw, gamma, beta, use_relu=True):
    """Pure-JAX f32 reference for correctness checking."""
    x = jnp.transpose(x_nchw, (0, 2, 3, 1)).astype(jnp.float32)
    w = jnp.transpose(weight_oihw, (2, 3, 1, 0)).astype(jnp.float32)  # HWIO
    y = jax.lax.conv_general_dilated(
        x, w, window_strides=(2, 2), padding=((1, 1), (1, 1)),
        dimension_numbers=("NHWC", "HWIO", "NHWC"))
    mean = jnp.mean(y, axis=(0, 1, 2), keepdims=True)
    var = jnp.mean((y - mean) ** 2, axis=(0, 1, 2), keepdims=True)
    out = (y - mean) * jax.lax.rsqrt(var + EPS) * gamma + beta
    if use_relu:
        out = jnp.maximum(out, 0.0)
    return jnp.transpose(out, (0, 3, 1, 2))


if __name__ == "__main__":
    # Small shapes consistent with the module: N=2, in_planes=4, H=W=16, planes=8.
    N, Cin, H, W, Cout = 2, 4, 16, 16, 8
    key = jax.random.PRNGKey(0)
    kx, kw, kg, kb = jax.random.split(key, 4)

    x = jax.random.normal(kx, (N, Cin, H, W), dtype=jnp.float32)
    weight = jax.random.normal(kw, (Cout, Cin, 3, 3), dtype=jnp.float32) * 0.1
    gamma = 1.0 + 0.1 * jax.random.normal(kg, (Cout,), dtype=jnp.float32)
    beta = 0.1 * jax.random.normal(kb, (Cout,), dtype=jnp.float32)

    fwd = jax.jit(strided_conv, static_argnames=("use_relu", "out_dtype"))
    out = jax.block_until_ready(fwd(x, weight, gamma, beta, use_relu=True))

    ref = _reference(x, weight, gamma, beta, use_relu=True)
    assert out.shape == (N, Cout, H // 2, W // 2), out.shape
    # bf16 taps/weights on the contraction + bf16 inter-pass activation -> loose tolerance.
    max_err = float(jnp.max(jnp.abs(out - ref)))
    mean_err = float(jnp.mean(jnp.abs(out - ref)))
    assert max_err < 3e-2 and mean_err < 4e-3, (max_err, mean_err)

    print("KERNEL_OK")
</pallas_src>

<mosaic_0001>
module attributes {stable_mosaic.version = 11 : i64} {
  func.func @_conv_stats_kernel(%arg0: i32, %arg1: i32, %arg2: memref<1x128x4xbf16, #tpu.memory_space<vmem>>, %arg3: memref<1x4x128xbf16, #tpu.memory_space<vmem>>, %arg4: memref<128x128xbf16, #tpu.memory_space<vmem>>, %arg5: memref<8x128xf32, #tpu.memory_space<vmem>>, %arg6: memref<128x128xf32, #tpu.memory_space<vmem>>) attributes {dimension_semantics = [#tpu.dimension_semantics<parallel>, #tpu.dimension_semantics<arbitrary>], iteration_bounds = array<i64: 1, 9>, scalar_prefetch = 0 : i64, scratch_operands = 1 : i64, tpu.core_type = #tpu.core_type<tc>, window_params = [{transform_indices = @transform_0, window_bounds = array<i64: 1, 128, 4>}, {transform_indices = @transform_1, window_bounds = array<i64: 1, 4, 128>}, {transform_indices = @transform_2, window_bounds = array<i64: 128, 128>}, {transform_indices = @transform_3, window_bounds = array<i64: 8, 128>}]} {
    %c0_i32 = arith.constant 0 : i32
    %0 = arith.cmpi eq, %arg1, %c0_i32 : i32
    %1 = arith.extui %0 : i1 to i32
    %c0_i32_0 = arith.constant 0 : i32
    %2 = arith.cmpi ne, %1, %c0_i32_0 : i32
    scf.if %2 {
      %cst_11 = arith.constant 0.000000e+00 : f32
      %46 = vector.broadcast %cst_11 : f32 to vector<128x128xf32>
      %c0_12 = arith.constant 0 : index
      %c0_13 = arith.constant 0 : index
      %47 = vector.load %arg6[%c0_12, %c0_13] : memref<128x128xf32, #tpu.memory_space<vmem>>, vector<128x128xf32>
      tpu.vector_store %arg6[%c0_12, %c0_13], %46 {strides = array<i32>} : memref<128x128xf32, #tpu.memory_space<vmem>>, vector<128x128xf32>,
    } else {
    }
    %c0 = arith.constant 0 : index
    %c0_1 = arith.constant 0 : index
    %c0_2 = arith.constant 0 : index
    %3 = vector.load %arg2[%c0, %c0_1, %c0_2] : memref<1x128x4xbf16, #tpu.memory_space<vmem>>, vector<1x128x4xbf16>
    %4 = vector.shape_cast %3 : vector<1x128x4xbf16> to vector<128x4xbf16>
    %c0_3 = arith.constant 0 : index
    %c0_4 = arith.constant 0 : index
    %c0_5 = arith.constant 0 : index
    %5 = vector.load %arg3[%c0_3, %c0_4, %c0_5] : memref<1x4x128xbf16, #tpu.memory_space<vmem>>, vector<1x4x128xbf16>
    %6 = vector.shape_cast %5 : vector<1x4x128xbf16> to vector<4x128xbf16>
    %cst = arith.constant 0.000000e+00 : f32
    %7 = vector.broadcast %cst : f32 to vector<128x128xf32>
    %8 = vector.extract_strided_slice %4 {offsets = [0, 0], sizes = [128, 1], strides = [1, 1]} : vector<128x4xbf16> to vector<128x1xbf16>
    %9 = arith.extf %8 : vector<128x1xbf16> to vector<128x1xf32>
    %10 = vector.extract_strided_slice %6 {offsets = [0, 0], sizes = [1, 128], strides = [1, 1]} : vector<4x128xbf16> to vector<1x128xbf16>
    %11 = arith.extf %10 : vector<1x128xbf16> to vector<1x128xf32>
    %12 = vector.broadcast %9 : vector<128x1xf32> to vector<128x128xf32>
    %13 = vector.broadcast %11 : vector<1x128xf32> to vector<128x128xf32>
    %14 = arith.mulf %12, %13 : vector<128x128xf32>
    %15 = arith.addf %7, %14 : vector<128x128xf32>
    %16 = vector.extract_strided_slice %4 {offsets = [0, 1], sizes = [128, 1], strides = [1, 1]} : vector<128x4xbf16> to vector<128x1xbf16>
    %17 = arith.extf %16 : vector<128x1xbf16> to vector<128x1xf32>
    %18 = vector.extract_strided_slice %6 {offsets = [1, 0], sizes = [1, 128], strides = [1, 1]} : vector<4x128xbf16> to vector<1x128xbf16>
    %19 = arith.extf %18 : vector<1x128xbf16> to vector<1x128xf32>
    %20 = vector.broadcast %17 : vector<128x1xf32> to vector<128x128xf32>
    %21 = vector.broadcast %19 : vector<1x128xf32> to vector<128x128xf32>
    %22 = arith.mulf %20, %21 : vector<128x128xf32>
    %23 = arith.addf %15, %22 : vector<128x128xf32>
    %24 = vector.extract_strided_slice %4 {offsets = [0, 2], sizes = [128, 1], strides = [1, 1]} : vector<128x4xbf16> to vector<128x1xbf16>
    %25 = arith.extf %24 : vector<128x1xbf16> to vector<128x1xf32>
    %26 = vector.extract_strided_slice %6 {offsets = [2, 0], sizes = [1, 128], strides = [1, 1]} : vector<4x128xbf16> to vector<1x128xbf16>
    %27 = arith.extf %26 : vector<1x128xbf16> to vector<1x128xf32>
    %28 = vector.broadcast %25 : vector<128x1xf32> to vector<128x128xf32>
    %29 = vector.broadcast %27 : vector<1x128xf32> to vector<128x128xf32>
    %30 = arith.mulf %28, %29 : vector<128x128xf32>
    %31 = arith.addf %23, %30 : vector<128x128xf32>
    %32 = vector.extract_strided_slice %4 {offsets = [0, 3], sizes = [128, 1], strides = [1, 1]} : vector<128x4xbf16> to vector<128x1xbf16>
    %33 = arith.extf %32 : vector<128x1xbf16> to vector<128x1xf32>
    %34 = vector.extract_strided_slice %6 {offsets = [3, 0], sizes = [1, 128], strides = [1, 1]} : vector<4x128xbf16> to vector<1x128xbf16>
    %35 = arith.extf %34 : vector<1x128xbf16> to vector<1x128xf32>
    %36 = vector.broadcast %33 : vector<128x1xf32> to vector<128x128xf32>
    %37 = vector.broadcast %35 : vector<1x128xf32> to vector<128x128xf32>
    %38 = arith.mulf %36, %37 : vector<128x128xf32>
    %39 = arith.addf %31, %38 : vector<128x128xf32>
    %c0_6 = arith.constant 0 : index
    %c0_7 = arith.constant 0 : index
    %40 = vector.load %arg6[%c0_6, %c0_7] : memref<128x128xf32, #tpu.memory_space<vmem>>, vector<128x128xf32>
    %41 = arith.addf %40, %39 : vector<128x128xf32>
    %c0_8 = arith.constant 0 : index
    %c0_9 = arith.constant 0 : index
    %42 = vector.load %arg6[%c0_8, %c0_9] : memref<128x128xf32, #tpu.memory_space<vmem>>, vector<128x128xf32>
    tpu.vector_store %arg6[%c0_8, %c0_9], %41 {strides = array<i32>} : memref<128x128xf32, #tpu.memory_space<vmem>>, vector<128x128xf32>,
    %c8_i32 = arith.constant 8 : i32
    %43 = arith.cmpi eq, %arg1, %c8_i32 : i32
    %44 = arith.extui %43 : i1 to i32
    %c0_i32_10 = arith.constant 0 : i32
    %45 = arith.cmpi ne, %44, %c0_i32_10 : i32
    scf.if %45 {
      %c0_11 = arith.constant 0 : index
      %c0_12 = arith.constant 0 : index
      %46 = vector.load %arg6[%c0_11, %c0_12] : memref<128x128xf32, #tpu.memory_space<vmem>>, vector<128x128xf32>
      %47 = arith.truncf %46 : vector<128x128xf32> to vector<128x128xbf16>
      %c0_13 = arith.constant 0 : index
      %c0_14 = arith.constant 0 : index
      %48 = vector.load %arg4[%c0_13, %c0_14] : memref<128x128xbf16, #tpu.memory_space<vmem>>, vector<128x128xbf16>
      tpu.vector_store %arg4[%c0_13, %c0_14], %47 {strides = array<i32>} : memref<128x128xbf16, #tpu.memory_space<vmem>>, vector<128x128xbf16>,
      %cst_15 = arith.constant dense<0.000000e+00> : vector<128xf32>
      %49 = vector.multi_reduction <add>, %46, %cst_15 [0] : vector<128x128xf32> to vector<128xf32>
      %50 = vector.shape_cast %49 : vector<128xf32> to vector<1x128xf32>
      %51 = arith.mulf %46, %46 : vector<128x128xf32>
      %cst_16 = arith.constant dense<0.000000e+00> : vector<128xf32>
      %52 = vector.multi_reduction <add>, %51, %cst_16 [0] : vector<128x128xf32> to vector<128xf32>
      %53 = vector.shape_cast %52 : vector<128xf32> to vector<1x128xf32>
      %cst_17 = arith.constant 0.000000e+00 : f32
      %54 = vector.broadcast %cst_17 : f32 to vector<8x128xf32>
      %c0_18 = arith.constant 0 : index
      %c0_19 = arith.constant 0 : index
      %55 = vector.load %arg5[%c0_18, %c0_19] : memref<8x128xf32, #tpu.memory_space<vmem>>, vector<8x128xf32>
      tpu.vector_store %arg5[%c0_18, %c0_19], %54 {strides = array<i32>} : memref<8x128xf32, #tpu.memory_space<vmem>>, vector<8x128xf32>,
      %c0_20 = arith.constant 0 : index
      %c0_21 = arith.constant 0 : index
      %56 = vector.load %arg5[%c0_20, %c0_21] : memref<8x128xf32, #tpu.memory_space<vmem>>, vector<1x128xf32>
      tpu.vector_store %arg5[%c0_20, %c0_21], %50 {strides = array<i32>} : memref<8x128xf32, #tpu.memory_space<vmem>>, vector<1x128xf32>,
      %c1 = arith.constant 1 : index
      %c0_22 = arith.constant 0 : index
      %57 = vector.load %arg5[%c1, %c0_22] : memref<8x128xf32, #tpu.memory_space<vmem>>, vector<1x128xf32>
      tpu.vector_store %arg5[%c1, %c0_22], %53 {strides = array<i32>} : memref<8x128xf32, #tpu.memory_space<vmem>>, vector<1x128xf32>,
    } else {
    }
    return
  }
  func.func @transform_0(%arg0: i32, %arg1: i32) -> (i32, i32, i32) {
    %c0_i32 = arith.constant 0 : i32
    %c0_i32_0 = arith.constant 0 : i32
    return %arg1, %arg0, %c0_i32 : i32, i32, i32
  }
  func.func @transform_1(%arg0: i32, %arg1: i32) -> (i32, i32, i32) {
    %c0_i32 = arith.constant 0 : i32
    %c0_i32_0 = arith.constant 0 : i32
    %c0_i32_1 = arith.constant 0 : i32
    return %arg1, %c0_i32, %c0_i32_0 : i32, i32, i32
  }
  func.func @transform_2(%arg0: i32, %arg1: i32) -> (i32, i32) {
    %c0_i32 = arith.constant 0 : i32
    %c0_i32_0 = arith.constant 0 : i32
    return %arg0, %c0_i32 : i32, i32
  }
  func.func @transform_3(%arg0: i32, %arg1: i32) -> (i32, i32) {
    %c0_i32 = arith.constant 0 : i32
    %c0_i32_0 = arith.constant 0 : i32
    return %arg0, %c0_i32 : i32, i32
  }
}

module attributes {stable_mosaic.version = 11 : i64} {
  func.func @_bn_relu_kernel(%arg0: i32, %arg1: memref<128x128xbf16, #tpu.memory_space<vmem>>, %arg2: memref<1x128xf32, #tpu.memory_space<vmem>>, %arg3: memref<1x128xf32, #tpu.memory_space<vmem>>, %arg4: memref<128x128xf32, #tpu.memory_space<vmem>>) attributes {dimension_semantics = [#tpu.dimension_semantics<parallel>], iteration_bounds = array<i64: 1>, scalar_prefetch = 0 : i64, scratch_operands = 0 : i64, tpu.core_type = #tpu.core_type<tc>, window_params = [{transform_indices = @transform_0, window_bounds = array<i64: 128, 128>}, {pipeline_mode = #tpu.pipeline_mode<synchronous>, transform_indices = @transform_1, window_bounds = array<i64: 1, 128>}, {pipeline_mode = #tpu.pipeline_mode<synchronous>, transform_indices = @transform_2, window_bounds = array<i64: 1, 128>}, {transform_indices = @transform_3, window_bounds = array<i64: 128, 128>}]} {
    %c0 = arith.constant 0 : index
    %c0_0 = arith.constant 0 : index
    %0 = vector.load %arg1[%c0, %c0_0] : memref<128x128xbf16, #tpu.memory_space<vmem>>, vector<128x128xbf16>
    %1 = arith.extf %0 : vector<128x128xbf16> to vector<128x128xf32>
    %c0_1 = arith.constant 0 : index
    %c0_2 = arith.constant 0 : index
    %2 = vector.load %arg2[%c0_1, %c0_2] : memref<1x128xf32, #tpu.memory_space<vmem>>, vector<1x128xf32>
    %3 = vector.broadcast %2 : vector<1x128xf32> to vector<128x128xf32>
    %4 = arith.mulf %1, %3 : vector<128x128xf32>
    %c0_3 = arith.constant 0 : index
    %c0_4 = arith.constant 0 : index
    %5 = vector.load %arg3[%c0_3, %c0_4] : memref<1x128xf32, #tpu.memory_space<vmem>>, vector<1x128xf32>
    %6 = vector.broadcast %5 : vector<1x128xf32> to vector<128x128xf32>
    %7 = arith.addf %4, %6 : vector<128x128xf32>
    %cst = arith.constant 0.000000e+00 : f32
    %8 = vector.broadcast %cst : f32 to vector<128x128xf32>
    %9 = arith.maximumf %7, %8 : vector<128x128xf32>
    %c0_5 = arith.constant 0 : index
    %c0_6 = arith.constant 0 : index
    %10 = vector.load %arg4[%c0_5, %c0_6] : memref<128x128xf32, #tpu.memory_space<vmem>>, vector<128x128xf32>
    tpu.vector_store %arg4[%c0_5, %c0_6], %9 {strides = array<i32>} : memref<128x128xf32, #tpu.memory_space<vmem>>, vector<128x128xf32>,
    return
  }
  func.func @transform_0(%arg0: i32) -> (i32, i32) {
    %c0_i32 = arith.constant 0 : i32
    %c0_i32_0 = arith.constant 0 : i32
    return %arg0, %c0_i32 : i32, i32
  }
  func.func @transform_1(%arg0: i32) -> (i32, i32) {
    %c0_i32 = arith.constant 0 : i32
    %c0_i32_0 = arith.constant 0 : i32
    %c0_i32_1 = arith.constant 0 : i32
    return %c0_i32, %c0_i32_0 : i32, i32
  }
  func.func @transform_2(%arg0: i32) -> (i32, i32) {
    %c0_i32 = arith.constant 0 : i32
    %c0_i32_0 = arith.constant 0 : i32
    %c0_i32_1 = arith.constant 0 : i32
    return %c0_i32, %c0_i32_0 : i32, i32
  }
  func.func @transform_3(%arg0: i32) -> (i32, i32) {
    %c0_i32 = arith.constant 0 : i32
    %c0_i32_0 = arith.constant 0 : i32
    return %arg0, %c0_i32 : i32, i32
  }
}

</mosaic_0001>

<bundles_post_ra>
// kernel: strided_conv.3
= control target key start
LH: loop header
LB: loop body
LE: loop exit
PB: predicated region body
PF: predicated region fallthrough
CT: control target
= control target key end

     0   :  { %s303_s0 = inlined_call_operand.vmem [shape: bf16[128,128], index: 0, kind: input, shape index: {}]   ;;  %s304_s1 = inlined_call_operand.vmem [shape: f32[1,128], index: 1, kind: input, shape index: {}]   ;;  %s305_s2 = inlined_call_operand.vmem [shape: f32[1,128], index: 2, kind: input, shape index: {}]   ;;  %s306_s3 = inlined_call_operand.vmem [shape: f32[128,128], index: 3, kind: output, shape index: {}]  }
   0x1   :  { %v131_v0 = vld [vmem:[%s303_s0] sm:$0xff]   ;;  %v162_v4 = vld [vmem:[%s303_s0 + $0x8] sm:$0xff]   ;;  %v163_v5 = vld [vmem:[%s303_s0 + $0x10] sm:$0xff]  }
   0x2   :  { %v195_v1 = vld [vmem:[%s304_s1] ss:$0 sm:$0xff]  ;;  %v132_v2 = vunpack.c.l.bf16 %v131_v0  ;;  %v133_v3 = vunpack.c.h.bf16 %v131_v0  ;;  %v164_v6 = vld [vmem:[%s303_s0 + $0x18] sm:$0xff]   ;;  %v136_v8 = vunpack.c.l.bf16 %v162_v4  ;;  %v137_v9 = vunpack.c.h.bf16 %v162_v4  ;;  %v166_v33 = vld [vmem:[%s303_s0 + $0x28] sm:$0xff]  }
   0x3   :  { %v209_v7 = vld [vmem:[%s305_s2] ss:$0 sm:$0xff]  ;;  %v140_v10 = vunpack.c.l.bf16 %v163_v5  ;;  %v141_v11 = vunpack.c.h.bf16 %v163_v5  ;;  %v144_v14 = vunpack.c.l.bf16 %v164_v6  ;;  %v145_v15 = vunpack.c.h.bf16 %v164_v6  ;;  %v167_v34 = vld [vmem:[%s303_s0 + $0x30] sm:$0xff]   ;;  %v168_v39 = vld [vmem:[%s303_s0 + $0x38] sm:$0xff]  }
   0x4   :  { %v53_v12 = vmul.f32 %v132_v2, %v195_v1  ;;  %v54_v13 = vmul.f32 %v133_v3, %v195_v1  ;;  %v55_v16 = vmul.f32 %v136_v8, %v195_v1  ;;  %v56_v17 = vmul.f32 %v137_v9, %v195_v1  ;;  %v165_v28 = vld [vmem:[%s303_s0 + $0x20] sm:$0xff]  }
   0x5   :  { %v57_v18 = vmul.f32 %v140_v10, %v195_v1  ;;  %v58_v19 = vmul.f32 %v141_v11, %v195_v1  ;;  %v59_v22 = vmul.f32 %v144_v14, %v195_v1  ;;  %v60_v23 = vmul.f32 %v145_v15, %v195_v1 }
   0x6   :  { %v76_v20 = vadd.f32 %v209_v7, %v53_v12  ;;  %v77_v21 = vadd.f32 %v209_v7, %v54_v13  ;;  %v78_v24 = vadd.f32 %v209_v7, %v55_v16  ;;  %v79_v25 = vadd.f32 %v209_v7, %v56_v17 }
   0x7   :  { %v80_v26 = vadd.f32 %v209_v7, %v57_v18  ;;  %v81_v27 = vadd.f32 %v209_v7, %v58_v19  ;;  %v82_v31 = vadd.f32 %v209_v7, %v59_v22  ;;  %v83_v32 = vadd.f32 %v209_v7, %v60_v23 }
   0x8   :  { %v92_v29 = vmax.f32 %v76_v20, 0.0  ;;  %v93_v30 = vmax.f32 %v77_v21, 0.0  ;;  %v94_v35 = vmax.f32 %v78_v24, 0.0  ;;  %v95_v36 = vmax.f32 %v79_v25, 0.0 }
   0x9   :  { %v96_v37 = vmax.f32 %v80_v26, 0.0  ;;  %v97_v38 = vmax.f32 %v81_v27, 0.0  ;;  %v98_v40 = vmax.f32 %v82_v31, 0.0  ;;  %v99_v41 = vmax.f32 %v83_v32, 0.0 }
   0xa   :  { %108 = vst [vmem:[%s306_s3] sm:$0xff] %v92_v29  ;;  %109 = vst [vmem:[%s306_s3 + $0x8] sm:$0xff] %v93_v30  ;;  %v148_v42 = vunpack.c.l.bf16 %v165_v28  ;;  %v149_v43 = vunpack.c.h.bf16 %v165_v28  ;;  %v152_v44 = vunpack.c.l.bf16 %v166_v33  ;;  %v153_v45 = vunpack.c.h.bf16 %v166_v33 }
   0xb   :  { %110 = vst [vmem:[%s306_s3 + $0x10] sm:$0xff] %v94_v35  ;;  %111 = vst [vmem:[%s306_s3 + $0x18] sm:$0xff] %v95_v36  ;;  %v156_v46 = vunpack.c.l.bf16 %v167_v34  ;;  %v157_v47 = vunpack.c.h.bf16 %v167_v34  ;;  %v160_v50 = vunpack.c.l.bf16 %v168_v39  ;;  %v161_v51 = vunpack.c.h.bf16 %v168_v39 }
   0xc   :  { %112 = vst [vmem:[%s306_s3 + $0x20] sm:$0xff] %v96_v37  ;;  %113 = vst [vmem:[%s306_s3 + $0x28] sm:$0xff] %v97_v38  ;;  %v61_v48 = vmul.f32 %v148_v42, %v195_v1  ;;  %v62_v49 = vmul.f32 %v149_v43, %v195_v1  ;;  %v63_v52 = vmul.f32 %v152_v44, %v195_v1 }
   0xd   :  { %114 = vst [vmem:[%s306_s3 + $0x30] sm:$0xff] %v98_v40  ;;  %115 = vst [vmem:[%s306_s3 + $0x38] sm:$0xff] %v99_v41  ;;  %v64_v53 = vmul.f32 %v153_v45, %v195_v1  ;;  %v65_v54 = vmul.f32 %v156_v46, %v195_v1  ;;  %v66_v55 = vmul.f32 %v157_v47, %v195_v1 }
   0xe   :  { %v84_v56 = vadd.f32 %v209_v7, %v61_v48  ;;  %v85_v57 = vadd.f32 %v209_v7, %v62_v49  ;;  %v67_v58 = vmul.f32 %v160_v50, %v195_v1  ;;  %v68_v59 = vmul.f32 %v161_v51, %v195_v1 }
   0xf   :  { %v86_v60 = vadd.f32 %v209_v7, %v63_v52  ;;  %v87_v61 = vadd.f32 %v209_v7, %v64_v53  ;;  %v88_v62 = vadd.f32 %v209_v7, %v65_v54  ;;  %v89_v63 = vadd.f32 %v209_v7, %v66_v55 }
  0x10   :  { %v100_v0 = vmax.f32 %v84_v56, 0.0  ;;  %v101_v2 = vmax.f32 %v85_v57, 0.0  ;;  %v90_v3 = vadd.f32 %v209_v7, %v67_v58  ;;  %v91_v4 = vadd.f32 %v209_v7, %v68_v59 }
  0x11   :  { %v102_v5 = vmax.f32 %v86_v60, 0.0  ;;  %v103_v6 = vmax.f32 %v87_v61, 0.0  ;;  %v104_v8 = vmax.f32 %v88_v62, 0.0  ;;  %v105_v9 = vmax.f32 %v89_v63, 0.0 }
  0x12   :  { %116 = vst [vmem:[%s306_s3 + $0x40] sm:$0xff] %v100_v0  ;;  %117 = vst [vmem:[%s306_s3 + $0x48] sm:$0xff] %v101_v2  ;;  %v106_v1 = vmax.f32 %v90_v3, 0.0  ;;  %v107_v10 = vmax.f32 %v91_v4, 0.0 }
  0x13   :  { %118 = vst [vmem:[%s306_s3 + $0x50] sm:$0xff] %v102_v5  ;;  %119 = vst [vmem:[%s306_s3 + $0x58] sm:$0xff] %v103_v6 }
  0x14   :  { %120 = vst [vmem:[%s306_s3 + $0x60] sm:$0xff] %v104_v8  ;;  %121 = vst [vmem:[%s306_s3 + $0x68] sm:$0xff] %v105_v9 }
  0x15   :  { %122 = vst [vmem:[%s306_s3 + $0x70] sm:$0xff] %v106_v1  ;;  %123 = vst [vmem:[%s306_s3 + $0x78] sm:$0xff] %v107_v10 }

// kernel: strided_conv.2
= control target key start
LH: loop header
LB: loop body
LE: loop exit
PB: predicated region body
PF: predicated region fallthrough
CT: control target
= control target key end

     0   :  { %s1396_s12 = smov 0   ;;  %s1398_s13 = smov 0   ;;  %s1602_s0 = inlined_call_operand.vmem [shape: bf16[9,128,4], index: 0, kind: input, shape index: {}]   ;;  %s1603_s1 = inlined_call_operand.vmem [shape: bf16[9,4,128], index: 1, kind: input, shape index: {}]   ;;  %s1604_s2 = inlined_call_operand.vmem [shape: bf16[128,128], index: 2, kind: output, shape index: {0}]   ;;  %s1605_s3 = inlined_call_operand.vmem [shape: f32[8,128], index: 3, kind: output, shape index: {1}]  }
   0x1   :  { %s1400_s14 = smov 0  }
   0x2 LB: > { %s23_s15 = sadd.s32 1, %s1364_s13  ;;  %p1018_p0 = scmp.ge.s32.totalorder %s1368_s14, 1  ;;  %s1368_s14 = sphi %s1400_s14, %s14_s14   ;;  %s1364_s13 = sphi %s1398_s13, %s1607_s13   ;;  %s1360_s12 = sphi %s1396_s12, %s1606_s12  }
   0x3   : > { %p24_p1 = scmp.ge.s32.totalorder %s23_s15, 9  ;;  %p168_p2 = scmp.lt.s32.totalorder %s1368_s14, 10 }
   0x5   : > { %s1609_s15 = smov (%p24_p1, %s23_s15), 0  ;;  %p169_p3 = pnand %p1018_p0, %p168_p2 }
   0x6   : > { %p205_p4 = scmp.lt.s32.totalorder (!%p169_p3), %s1360_s12, 8  ;;  %p1022_p5 = scmp.ne.s32.totalorder (!%p169_p3), %s1360_s12, 0 }
   0x7   : > { %172 = sbr.rel (%p169_p3) target bundleno = 272 (0x110), region = 28 }
   0xe   : > { %s206_s16 = scalar_select %p205_p4, %s1360_s12, 8 }
   0xf   : > { %231 = sbr.rel (%p1022_p5) target bundleno = 24 (0x18), region = 32  ;;  %v1370_v0 = vmov (!%p1022_p5), 0.0  }
  0x10   : > { %s1045_s17 = sshll.u32 %s206_s16, 6  ;;  %s1021_s18 = sshll.u32 %s206_s16, 1  ;;  %232 = vst [vmem:[#allocation2] sm:$0xff] (!%p1022_p5), %v1370_v0  ;;  %233 = vst [vmem:[#allocation2 + $0x8] sm:$0xff] (!%p1022_p5), %v1370_v0 }
  0x11   : > { %s1421_s21 = scalar_lea.vmem %s1602_s0, %s1045_s17  ;;  %s1426_s24 = scalar_lea.vmem %s1603_s1, %s1021_s18  ;;  %234 = vst [vmem:[#allocation2 + $0x10] sm:$0xff] (!%p1022_p5), %v1370_v0  ;;  %235 = vst [vmem:[#allocation2 + $0x18] sm:$0xff] (!%p1022_p5), %v1370_v0 }
  0x12   : > { %236 = vst [vmem:[#allocation2 + $0x20] sm:$0xff] (!%p1022_p5), %v1370_v0  ;;  %237 = vst [vmem:[#allocation2 + $0x28] sm:$0xff] (!%p1022_p5), %v1370_v0 }
  0x13   : > { %238 = vst [vmem:[#allocation2 + $0x30] sm:$0xff] (!%p1022_p5), %v1370_v0  ;;  %239 = vst [vmem:[#allocation2 + $0x38] sm:$0xff] (!%p1022_p5), %v1370_v0 }
  0x14   : > { %240 = vst [vmem:[#allocation2 + $0x40] sm:$0xff] (!%p1022_p5), %v1370_v0  ;;  %241 = vst [vmem:[#allocation2 + $0x48] sm:$0xff] (!%p1022_p5), %v1370_v0 }
  0x15   : > { %242 = vst [vmem:[#allocation2 + $0x50] sm:$0xff] (!%p1022_p5), %v1370_v0  ;;  %243 = vst [vmem:[#allocation2 + $0x58] sm:$0xff] (!%p1022_p5), %v1370_v0 }
  0x16   : > { %244 = vst [vmem:[#allocation2 + $0x60] sm:$0xff] %v1370_v0  ;;  %245 = vst [vmem:[#allocation2 + $0x68] sm:$0xff] %v1370_v0 }
  0x17   : > { %246 = vst [vmem:[#allocation2 + $0x70] sm:$0xff] %v1370_v0  ;;  %247 = vst [vmem:[#allocation2 + $0x78] sm:$0xff] %v1370_v0 }
  0x18 PF: > { %v1135_v1 = vld [vmem:[%s1421_s21 + $0x10] sm:$0xff]   ;;  %v1063_v2 = vld [vmem:[%s1421_s21] sm:$0xff]   ;;  %v1136_v3 = vld [vmem:[%s1421_s21 + $0x18] sm:$0xff]   ;;  %v1371_v4 = vmov 0   ;;  %v1372_v34 = vmov 1   ;;  %v1373_v35 = vmov 2   ;;  %v362_v43 = vlaneseq }
  0x19   : > { %1189 = vset.pattern.permute.xlu1 %v1371_v4  ;;  %1178 = vset.pattern.permute.xlu0 %v1371_v4  ;;  %v1072_v5 = vunpack.c.l.bf16 %v1135_v1  ;;  %v1073_v6 = vunpack.c.h.bf16 %v1135_v1  ;;  %v1064_v7 = vunpack.c.l.bf16 %v1063_v2  ;;  %v1065_v8 = vunpack.c.h.bf16 %v1063_v2  ;;  %v1134_v9 = vld [vmem:[%s1421_s21 + $0x8] sm:$0xff]   ;;  %v1137_v15 = vld [vmem:[%s1421_s21 + $0x20] sm:$0xff]   ;;  %v1140_v24 = vld [vmem:[%s1421_s21 + $0x38] sm:$0xff]   ;;  %p1023_p6 = scmp.ne.s32.totalorder %s1360_s12, 8 }
  0x1a   : > { %v1138_v10 = vld [vmem:[%s1421_s21 + $0x28] sm:$0xff]   ;;  %v1076_v11 = vunpack.c.l.bf16 %v1136_v3  ;;  %v1077_v12 = vunpack.c.h.bf16 %v1136_v3  ;;  %v1068_v13 = vunpack.c.l.bf16 %v1134_v9  ;;  %v1069_v14 = vunpack.c.h.bf16 %v1134_v9  ;;  %v1139_v25 = vld [vmem:[%s1421_s21 + $0x30] sm:$0xff]   ;;  %v264_v47 = vld [vmem:[%s1426_s24] sm:$0x3] }
  0x1b   : > { %v1190_v16 = vpack.i.bf16 %v1073_v6, %v1072_v5  ;;  %v1179_v17 = vpack.i.bf16 %v1065_v8, %v1064_v7  ;;  %v1084_v18 = vunpack.c.l.bf16 %v1138_v10  ;;  %v1085_v19 = vunpack.c.h.bf16 %v1138_v10 }
  0x1c   : > { %v1195_v20 = vpack.i.bf16 %v1077_v12, %v1076_v11  ;;  %v1184_v21 = vpack.i.bf16 %v1069_v14, %v1068_v13  ;;  %v1080_v22 = vunpack.c.l.bf16 %v1137_v15  ;;  %v1081_v23 = vunpack.c.h.bf16 %v1137_v15 }
  0x1d   : > { %1191 = vperm.xlu1 %1189, %v1190_v16   ;;  %1180 = vperm.xlu0 %1178, %v1179_v17   ;;  %v1205_v26 = vpack.i.bf16 %v1085_v19, %v1084_v18  ;;  %v1092_v27 = vunpack.c.l.bf16 %v1140_v24  ;;  %v1093_v29 = vunpack.c.h.bf16 %v1140_v24  ;;  %v1088_v30 = vunpack.c.l.bf16 %v1139_v25 }
  0x1e   : > { %v1200_v28 = vpack.i.bf16 %v1081_v23, %v1080_v22  ;;  %v1089_v31 = vunpack.c.h.bf16 %v1139_v25  ;;  %v1374_v36 = vmov 3   ;;  %v363_v46 = vshrl.u32 %v362_v43, 7 }
  0x1f   : > { %v1215_v32 = vpack.i.bf16 %v1093_v29, %v1092_v27  ;;  %v281_v50 = vunpack.c.l.bf16 %v264_v47 }
  0x20   : > { %v1210_v33 = vpack.i.bf16 %v1089_v31, %v1088_v30  ;;  %v364_v51 = vsub.s32 0, %v363_v46  ;;  %v464_v52 = vsub.s32 1, %v363_v46  ;;  %v564_v55 = vsub.s32 2, %v363_v46 }
  0x21   : > { %1196 = vperm.xlu1 %1189, %v1195_v20   ;;  %1185 = vperm.xlu0 %1178, %v1184_v21   ;;  %v664_v56 = vsub.s32 3, %v363_v46 }
  0x22   : > { %v365_v57 = vrot.slane %v281_v50, %v364_v51  ;;  %v1444_v0 = vrot.slane %v281_v50, %v464_v52  ;;  %v1448_v5 = vrot.slane %v281_v50, %v564_v55 }
  0x23   : > { %v1450_v6 = vrot.slane %v281_v50, %v664_v56 }
  0x25   : > { %1206 = vperm.xlu1 %1189, %v1205_v26   ;;  %1201 = vperm.xlu0 %1178, %v1200_v28  }
  0x29   : > { %1216 = vperm.xlu1 %1189, %v1215_v32   ;;  %1211 = vperm.xlu0 %1178, %v1210_v33  }
  0x2d   : > { %1226 = vset.pattern.permute.xlu1 %v1372_v34  ;;  %1220 = vset.pattern.permute.xlu0 %v1372_v34 }
  0x2e   : > { %1228 = vperm.xlu1 %1226, %v1184_v21   ;;  %1222 = vperm.xlu0 %1220, %v1179_v17  }
  0x32   : > { %1233 = vperm.xlu1 %1226, %v1190_v16   ;;  %1238 = vperm.xlu0 %1220, %v1195_v20  }
  0x36   : > { %1243 = vperm.xlu1 %1226, %v1200_v28   ;;  %1248 = vperm.xlu0 %1220, %v1205_v26  }
  0x3a   : > { %1253 = vperm.xlu1 %1226, %v1210_v33   ;;  %1258 = vperm.xlu0 %1220, %v1215_v32  }
  0x3e   : > { %1262 = vset.pattern.permute.xlu1 %v1373_v35  ;;  %1268 = vset.pattern.permute.xlu0 %v1373_v35 }
  0x3f   : > { %1264 = vperm.xlu1 %1262, %v1179_v17   ;;  %1270 = vperm.xlu0 %1268, %v1184_v21  }
  0x43   : > { %1275 = vperm.xlu1 %1262, %v1190_v16   ;;  %1285 = vperm.xlu0 %1268, %v1200_v28  }
  0x47   : > { %1280 = vperm.xlu1 %1262, %v1195_v20   ;;  %1295 = vperm.xlu0 %1268, %v1210_v33  }
  0x4b   : > { %1290 = vperm.xlu1 %1262, %v1205_v26   ;;  %1304 = vset.pattern.permute.xlu0 %v1374_v36 }
  0x4c   : > { %1306 = vperm.xlu0 %1304, %v1179_v17  }
  0x4f   : > { %1300 = vperm.xlu1 %1262, %v1215_v32  }
  0x50   : > { %1322 = vperm.xlu0 %1304, %v1195_v20  }
  0x53   : > { %1310 = vset.pattern.permute.xlu1 %v1374_v36 }
  0x54   : > { %1312 = vperm.xlu1 %1310, %v1184_v21   ;;  %1332 = vperm.xlu0 %1304, %v1205_v26  }
  0x58   : > { %1317 = vperm.xlu1 %1310, %v1190_v16   ;;  %1342 = vperm.xlu0 %1304, %v1215_v32  }
  0x5c   : > { %1327 = vperm.xlu1 %1310, %v1200_v28  }
  0x60   : > { %1337 = vperm.xlu1 %1310, %v1210_v33  }
  0x9c   : > { %v1192_v37 = vpop.permute.xlu1 %1191  ;;  %v1181_v38 = vpop.permute.xlu0 %1180 }
  0x9d   : > { %v1194_v58 = vunpack.i.h.bf16 %v1192_v37  ;;  %v1193_v59 = vunpack.i.l.bf16 %v1192_v37  ;;  %v1183_v60 = vunpack.i.h.bf16 %v1181_v38  ;;  %v1182_v61 = vunpack.i.l.bf16 %v1181_v38 }
  0x9f   : > { %v371_v7 = vmul.f32 %v1194_v58, %v365_v57  ;;  %v370_v8 = vmul.f32 %v1193_v59, %v365_v57  ;;  %v367_v11 = vmul.f32 %v1183_v60, %v365_v57  ;;  %v366_v12 = vmul.f32 %v1182_v61, %v365_v57 }
  0xa0   : > { %v1197_v39 = vpop.permute.xlu1 %1196  ;;  %v1186_v40 = vpop.permute.xlu0 %1185 }
  0xa1   : > { %v1199_v62 = vunpack.i.h.bf16 %v1197_v39  ;;  %v1198_v63 = vunpack.i.l.bf16 %v1197_v39  ;;  %v1188_v1 = vunpack.i.h.bf16 %v1186_v40  ;;  %v1187_v2 = vunpack.i.l.bf16 %v1186_v40 }
  0xa3   : > { %v373_v15 = vmul.f32 %v1199_v62, %v365_v57  ;;  %v372_v16 = vmul.f32 %v1198_v63, %v365_v57  ;;  %v369_v19 = vmul.f32 %v1188_v1, %v365_v57  ;;  %v368_v20 = vmul.f32 %v1187_v2, %v365_v57 }
  0xa4   : > { %v1207_v41 = vpop.permute.xlu1 %1206  ;;  %v1202_v42 = vpop.permute.xlu0 %1201 }
  0xa5   : > { %v1209_v9 = vunpack.i.h.bf16 %v1207_v41  ;;  %v1208_v10 = vunpack.i.l.bf16 %v1207_v41  ;;  %v1204_v13 = vunpack.i.h.bf16 %v1202_v42  ;;  %v1203_v14 = vunpack.i.l.bf16 %v1202_v42 }
  0xa7   : > { %v377_v25 = vmul.f32 %v1209_v9, %v365_v57  ;;  %v376_v26 = vmul.f32 %v1208_v10, %v365_v57  ;;  %v375_v29 = vmul.f32 %v1204_v13, %v365_v57  ;;  %v374_v30 = vmul.f32 %v1203_v14, %v365_v57 }
  0xa8   : > { %v1437_v44 = vpop.permute.xlu1 %1216  ;;  %v1439_v45 = vpop.permute.xlu0 %1211 }
  0xa9   : > { %v1219_v31 = vunpack.i.h.bf16 %v1437_v44  ;;  %v1218_v32 = vunpack.i.l.bf16 %v1437_v44  ;;  %v1214_v33 = vunpack.i.h.bf16 %v1439_v45  ;;  %v1213_v34 = vunpack.i.l.bf16 %v1439_v45 }
  0xab   : > { %v381_v47 = vmul.f32 %v1219_v31, %v365_v57  ;;  %v1470_v51 = vmul.f32 %v1214_v33, %v365_v57  ;;  %v1472_v52 = vmul.f32 %v1213_v34, %v365_v57 }
  0xad   : > { %v1229_v48 = vpop.permute.xlu1 %1228  ;;  %v1223_v49 = vpop.permute.xlu0 %1222 }
  0xae   : > { %v1231_v17 = vunpack.i.h.bf16 %v1229_v48  ;;  %v1230_v18 = vunpack.i.l.bf16 %v1229_v48  ;;  %v1225_v21 = vunpack.i.h.bf16 %v1223_v49  ;;  %v1224_v22 = vunpack.i.l.bf16 %v1223_v49 }
  0xaf   : > { %v380_v48 = vmul.f32 %v1218_v32, %v365_v57 }
  0xb0   : > { %v469_v35 = vmul.f32 %v1231_v17, %v1444_v0  ;;  %v468_v36 = vmul.f32 %v1230_v18, %v1444_v0  ;;  %v467_v37 = vmul.f32 %v1225_v21, %v1444_v0  ;;  %v466_v38 = vmul.f32 %v1224_v22, %v1444_v0 }
  0xb1   : > { %v1234_v53 = vpop.permute.xlu1 %1233  ;;  %v1442_v54 = vpop.permute.xlu0 %1238 }
  0xb2   : > { %v1236_v27 = vunpack.i.h.bf16 %v1234_v53  ;;  %v1235_v28 = vunpack.i.l.bf16 %v1234_v53  ;;  %v1241_v39 = vunpack.i.h.bf16 %v1442_v54  ;;  %v1240_v40 = vunpack.i.l.bf16 %v1442_v54 }
  0xb3   : > { %v484_v53 = vadd.f32 %v468_v36, %v368_v20  ;;  %v485_v54 = vadd.f32 %v469_v35, %v369_v19  ;;  %v482_v55 = vadd.f32 %v466_v38, %v366_v12  ;;  %v483_v56 = vadd.f32 %v467_v37, %v367_v11 }
  0xb4   : > { %v471_v41 = vmul.f32 %v1236_v27, %v1444_v0  ;;  %v470_v42 = vmul.f32 %v1235_v28, %v1444_v0  ;;  %v473_v58 = vmul.f32 %v1241_v39, %v1444_v0  ;;  %v472_v59 = vmul.f32 %v1240_v40, %v1444_v0 }
  0xb5   : > { %v1244_v3 = vpop.permute.xlu1 %1243  ;;  %v1446_v4 = vpop.permute.xlu0 %1248 }
  0xb6   : > { %v1246_v43 = vunpack.i.h.bf16 %v1244_v3  ;;  %v1245_v44 = vunpack.i.l.bf16 %v1244_v3  ;;  %v1251_v49 = vunpack.i.h.bf16 %v1446_v4  ;;  %v1250_v50 = vunpack.i.l.bf16 %v1446_v4 }
  0xb7   : > { %v487_v60 = vadd.f32 %v471_v41, %v371_v7  ;;  %v486_v61 = vadd.f32 %v470_v42, %v370_v8  ;;  %v489_v7 = vadd.f32 %v473_v58, %v373_v15  ;;  %v488_v8 = vadd.f32 %v472_v59, %v372_v16 }
  0xb8   : > { %v475_v62 = vmul.f32 %v1246_v43, %v1444_v0  ;;  %v474_v63 = vmul.f32 %v1245_v44, %v1444_v0  ;;  %v477_v3 = vmul.f32 %v1251_v49, %v1444_v0  ;;  %v476_v57 = vmul.f32 %v1250_v50, %v1444_v0 }
  0xb9   : > { %v1452_v23 = vpop.permute.xlu1 %1253  ;;  %v1454_v24 = vpop.permute.xlu0 %1258 }
  0xba   : > { %v1261_v4 = vunpack.i.h.bf16 %v1454_v24  ;;  %v1260_v9 = vunpack.i.l.bf16 %v1454_v24  ;;  %v1256_v14 = vunpack.i.h.bf16 %v1452_v23  ;;  %v1255_v17 = vunpack.i.l.bf16 %v1452_v23 }
  0xbb   : > { %v1484_v18 = vadd.f32 %v474_v63, %v374_v30  ;;  %v1486_v19 = vadd.f32 %v475_v62, %v375_v29  ;;  %v1490_v24 = vadd.f32 %v477_v3, %v377_v25  ;;  %v492_v28 = vadd.f32 %v476_v57, %v376_v26  ;;  %v699_v3 = vld [vmem:[#allocation2 + $0x8] sm:$0xff] }
  0xbc   : > { %v481_v31 = vmul.f32 %v1261_v4, %v1444_v0  ;;  %v480_v15 = vmul.f32 %v1260_v9, %v1444_v0  ;;  %v1499_v32 = vmul.f32 %v1256_v14, %v1444_v0  ;;  %v1502_v33 = vmul.f32 %v1255_v17, %v1444_v0 }
  0xbe   : > { %v1265_v46 = vpop.permute.xlu1 %1264  ;;  %v1271_v45 = vpop.permute.xlu0 %1270  ;;  %v497_v39 = vadd.f32 %v481_v31, %v381_v47  ;;  %v496_v40 = vadd.f32 %v480_v15, %v380_v48 }
  0xbf   : > { %v1267_v10 = vunpack.i.h.bf16 %v1265_v46  ;;  %v1266_v11 = vunpack.i.l.bf16 %v1265_v46  ;;  %v1273_v12 = vunpack.i.h.bf16 %v1271_v45  ;;  %v1272_v13 = vunpack.i.l.bf16 %v1271_v45 }
  0xc1   : > { %v567_v16 = vmul.f32 %v1267_v10, %v1448_v5  ;;  %v566_v23 = vmul.f32 %v1266_v11, %v1448_v5  ;;  %v569_v30 = vmul.f32 %v1273_v12, %v1448_v5  ;;  %v568_v29 = vmul.f32 %v1272_v13, %v1448_v5 }
  0xc2   : > { %v1276_v1 = vpop.permute.xlu1 %1275  ;;  %v1286_v2 = vpop.permute.xlu0 %1285 }
  0xc3   : > { %v1278_v20 = vunpack.i.h.bf16 %v1276_v1  ;;  %v1277_v21 = vunpack.i.l.bf16 %v1276_v1  ;;  %v1288_v36 = vunpack.i.h.bf16 %v1286_v2  ;;  %v1287_v37 = vunpack.i.l.bf16 %v1286_v2 }
  0xc4   : > { %v582_v44 = vadd.f32 %v566_v23, %v482_v55  ;;  %v583_v46 = vadd.f32 %v567_v16, %v483_v56  ;;  %v1506_v45 = vadd.f32 %v568_v29, %v484_v53  ;;  %v1508_v0 = vadd.f32 %v569_v30, %v485_v54  ;;  %v704_v23 = vld [vmem:[#allocation2 + $0x30] sm:$0xff]  ;;  %v705_v30 = vld [vmem:[#allocation2 + $0x38] sm:$0xff] }
  0xc5   : > { %v571_v34 = vmul.f32 %v1278_v20, %v1448_v5  ;;  %v570_v35 = vmul.f32 %v1277_v21, %v1448_v5  ;;  %v1517_v47 = vmul.f32 %v1288_v36, %v1448_v5  ;;  %v1520_v48 = vmul.f32 %v1287_v37, %v1448_v5 }
  0xc6   : > { %v1281_v22 = vpop.permute.xlu1 %1280  ;;  %v1488_v27 = vpop.permute.xlu0 %1295 }
  0xc7   : > { %v1283_v25 = vunpack.i.h.bf16 %v1281_v22  ;;  %v1282_v26 = vunpack.i.l.bf16 %v1281_v22  ;;  %v1512_v62 = vadd.f32 %v571_v34, %v487_v60  ;;  %v1514_v63 = vadd.f32 %v570_v35, %v486_v61  ;;  %v698_v60 = vld [vmem:[#allocation2] sm:$0xff] }
  0xc8   : > { %v1298_v22 = vunpack.i.h.bf16 %v1488_v27  ;;  %v1297_v31 = vunpack.i.l.bf16 %v1488_v27 }
  0xc9   : > { %v573_v49 = vmul.f32 %v1283_v25, %v1448_v5  ;;  %v572_v50 = vmul.f32 %v1282_v26, %v1448_v5 }
  0xca   : > { %v1291_v38 = vpop.permute.xlu1 %1290 }
  0xcb   : > { %v1293_v41 = vunpack.i.h.bf16 %v1291_v38  ;;  %v1292_v42 = vunpack.i.l.bf16 %v1291_v38  ;;  %v1307_v43 = vpop.permute.xlu0 %1306  ;;  %v588_v10 = vadd.f32 %v572_v50, %v488_v8  ;;  %v589_v11 = vadd.f32 %v573_v49, %v489_v7 }
  0xcc   : > { %v1309_v58 = vunpack.i.h.bf16 %v1307_v43  ;;  %v1308_v59 = vunpack.i.l.bf16 %v1307_v43 }
  0xcd   : > { %v577_v54 = vmul.f32 %v1293_v41, %v1448_v5  ;;  %v576_v55 = vmul.f32 %v1292_v42, %v1448_v5 }
  0xce   : > { %v1301_v53 = vpop.permute.xlu1 %1300  ;;  %v667_v56 = vmul.f32 %v1309_v58, %v1450_v6  ;;  %v666_v1 = vmul.f32 %v1308_v59, %v1450_v6  ;;  %v701_v59 = vld [vmem:[#allocation2 + $0x18] sm:$0xff] }
  0xcf   : > { %v1323_v2 = vpop.permute.xlu0 %1322  ;;  %v1303_v61 = vunpack.i.h.bf16 %v1301_v53  ;;  %v1302_v57 = vunpack.i.l.bf16 %v1301_v53  ;;  %v592_v29 = vadd.f32 %v576_v55, %v492_v28  ;;  %v593_v25 = vadd.f32 %v577_v54, %v1490_v24  ;;  %v708_v53 = vld [vmem:[#allocation2 + $0x50] sm:$0xff]  ;;  %v709_v54 = vld [vmem:[#allocation2 + $0x58] sm:$0xff] }
  0xd0   : > { %v1325_v4 = vunpack.i.h.bf16 %v1323_v2  ;;  %v1324_v9 = vunpack.i.l.bf16 %v1323_v2  ;;  %v682_v12 = vadd.f32 %v666_v1, %v582_v44  ;;  %v683_v13 = vadd.f32 %v667_v56, %v583_v46  ;;  %v700_v44 = vld [vmem:[#allocation2 + $0x10] sm:$0xff] }
  0xd1   : > { %v581_v14 = vmul.f32 %v1303_v61, %v1448_v5  ;;  %v580_v17 = vmul.f32 %v1302_v57, %v1448_v5  ;;  %v702_v61 = vld [vmem:[#allocation2 + $0x20] sm:$0xff] }
  0xd2   : > { %v673_v20 = vmul.f32 %v1325_v4, %v1450_v6  ;;  %v672_v21 = vmul.f32 %v1324_v9, %v1450_v6  ;;  %v714_v15 = vadd.f32 %v698_v60, %v682_v12  ;;  %v715_v16 = vadd.f32 %v699_v3, %v683_v13 }
  0xd3   : > { %v1313_v8 = vpop.permute.xlu1 %1312  ;;  %v1333_v7 = vpop.permute.xlu0 %1332  ;;  %v596_v41 = vadd.f32 %v580_v17, %v496_v40  ;;  %v597_v42 = vadd.f32 %v581_v14, %v497_v39  ;;  %v703_v17 = vld [vmem:[#allocation2 + $0x28] sm:$0xff] }
  0xd4   : > { %v688_v26 = vadd.f32 %v672_v21, %v588_v10  ;;  %v689_v34 = vadd.f32 %v673_v20, %v589_v11  ;;  %730 = vst [vmem:[#allocation2] sm:$0xff] %v714_v15  ;;  %731 = vst [vmem:[#allocation2 + $0x8] sm:$0xff] %v715_v16  ;;  %v1315_v35 = vunpack.i.h.bf16 %v1313_v8  ;;  %v1314_v36 = vunpack.i.l.bf16 %v1313_v8  ;;  %v712_v20 = vld [vmem:[#allocation2 + $0x70] sm:$0xff] }
  0xd5   : > { %v1335_v37 = vunpack.i.h.bf16 %v1333_v7  ;;  %v1334_v38 = vunpack.i.l.bf16 %v1333_v7  ;;  %v578_v8 = vmul.f32 %v1297_v31, %v1448_v5 }
  0xd6   : > { %v720_v27 = vadd.f32 %v704_v23, %v688_v26  ;;  %v721_v43 = vadd.f32 %v705_v30, %v689_v34  ;;  %v669_v46 = vmul.f32 %v1315_v35, %v1450_v6  ;;  %v668_v49 = vmul.f32 %v1314_v36, %v1450_v6 }
  0xd7   : > { %v677_v28 = vmul.f32 %v1335_v37, %v1450_v6  ;;  %v676_v24 = vmul.f32 %v1334_v38, %v1450_v6  ;;  %v1318_v50 = vpop.permute.xlu1 %1317  ;;  %v1343_v58 = vpop.permute.xlu0 %1342  ;;  %v579_v30 = vmul.f32 %v1298_v22, %v1448_v5  ;;  %v494_v36 = vadd.f32 %v1502_v33, %v1472_v52  ;;  %v706_v38 = vld [vmem:[#allocation2 + $0x40] sm:$0xff] }
  0xd8   : > { %736 = vst [vmem:[#allocation2 + $0x30] sm:$0xff] %v720_v27  ;;  %737 = vst [vmem:[#allocation2 + $0x38] sm:$0xff] %v721_v43  ;;  %v1320_v40 = vunpack.i.h.bf16 %v1318_v50  ;;  %v1319_v39 = vunpack.i.l.bf16 %v1318_v50  ;;  %v1345_v55 = vunpack.i.h.bf16 %v1343_v58  ;;  %v1344_v56 = vunpack.i.l.bf16 %v1343_v58 }
  0xd9   : > { %v684_v1 = vadd.f32 %v668_v49, %v1506_v45  ;;  %v685_v2 = vadd.f32 %v669_v46, %v1508_v0  ;;  %v692_v60 = vadd.f32 %v676_v24, %v592_v29  ;;  %v693_v3 = vadd.f32 %v677_v28, %v593_v25  ;;  %v713_v45 = vld [vmem:[#allocation2 + $0x78] sm:$0xff]  ;;  %v710_v46 = vld [vmem:[#allocation2 + $0x60] sm:$0xff] }
  0xda   : > { %v671_v57 = vmul.f32 %v1320_v40, %v1450_v6  ;;  %v670_v4 = vmul.f32 %v1319_v39, %v1450_v6  ;;  %v681_v9 = vmul.f32 %v1345_v55, %v1450_v6  ;;  %v680_v10 = vmul.f32 %v1344_v56, %v1450_v6 }
  0xdb   : > { %v716_v11 = vadd.f32 %v700_v44, %v684_v1  ;;  %v717_v12 = vadd.f32 %v701_v59, %v685_v2  ;;  %v724_v13 = vadd.f32 %v708_v53, %v692_v60  ;;  %v725_v14 = vadd.f32 %v709_v54, %v693_v3  ;;  %v1328_v21 = vpop.permute.xlu1 %1327  ;;  %v750_v50 = vld [vmem:[#allocation2] sm:$0xff] (!%p1023_p6)  ;;  %v751_v58 = vld [vmem:[#allocation2 + $0x8] sm:$0xff] (!%p1023_p6) }
  0xdc   : > { %v686_v0 = vadd.f32 %v670_v4, %v1514_v63  ;;  %v687_v15 = vadd.f32 %v671_v57, %v1512_v62  ;;  %v696_v16 = vadd.f32 %v680_v10, %v596_v41  ;;  %v697_v23 = vadd.f32 %v681_v9, %v597_v42 }
  0xdd   : > { %732 = vst [vmem:[#allocation2 + $0x10] sm:$0xff] %v716_v11  ;;  %733 = vst [vmem:[#allocation2 + $0x18] sm:$0xff] %v717_v12  ;;  %v1330_v7 = vunpack.i.h.bf16 %v1328_v21  ;;  %v1329_v29 = vunpack.i.l.bf16 %v1328_v21  ;;  %v590_v63 = vadd.f32 %v1520_v48, %v1484_v18  ;;  %v591_v62 = vadd.f32 %v1517_v47, %v1486_v19  ;;  %v707_v18 = vld [vmem:[#allocation2 + $0x48] sm:$0xff] }
  0xde   : > { %740 = vst [vmem:[#allocation2 + $0x50] sm:$0xff] %v724_v13  ;;  %741 = vst [vmem:[#allocation2 + $0x58] sm:$0xff] %v725_v14  ;;  %v718_v25 = vadd.f32 %v702_v61, %v686_v0  ;;  %v719_v26 = vadd.f32 %v703_v17, %v687_v15  ;;  %v728_v34 = vadd.f32 %v712_v20, %v696_v16  ;;  %v1375_v53 = vmov (!%p1023_p6), 0.0  }
  0xdf   : > { %v729_v35 = vadd.f32 %v713_v45, %v697_v23  ;;  %v675_v22 = vmul.f32 %v1330_v7, %v1450_v6  ;;  %v674_v5 = vmul.f32 %v1329_v29, %v1450_v6  ;;  %v1338_v31 = vpop.permute.xlu1 %1337  ;;  %v495_v37 = vadd.f32 %v1499_v32, %v1470_v51  ;;  %v711_v51 = vld [vmem:[#allocation2 + $0x68] sm:$0xff]  ;;  %904 = vst [vmem:[%s1605_s3] sm:$0xff] (!%p1023_p6), %v1375_v53  ;;  %v756_v61 = vld [vmem:[#allocation2 + $0x30] sm:$0xff] (!%p1023_p6)  ;;  %v757_v10 = vld [vmem:[#allocation2 + $0x38] sm:$0xff] (!%p1023_p6) }
  0xe0   : > { %734 = vst [vmem:[#allocation2 + $0x20] sm:$0xff] %v718_v25  ;;  %735 = vst [vmem:[#allocation2 + $0x28] sm:$0xff] %v719_v26  ;;  %v1340_v48 = vunpack.i.h.bf16 %v1338_v31  ;;  %v1339_v41 = vunpack.i.l.bf16 %v1338_v31  ;;  %v594_v42 = vadd.f32 %v578_v8, %v494_v36  ;;  %v846_v54 = vadd.f32 (!%p1023_p6), %v751_v58, %v750_v50 }
  0xe1   : > { %744 = vst [vmem:[#allocation2 + $0x70] sm:$0xff] %v728_v34  ;;  %745 = vst [vmem:[#allocation2 + $0x78] sm:$0xff] %v729_v35  ;;  %v690_v19 = vadd.f32 %v674_v5, %v590_v63  ;;  %v691_v47 = vadd.f32 %v675_v22, %v591_v62  ;;  %v595_v27 = vadd.f32 %v579_v30, %v495_v37 }
  0xe2   : > { %v679_v43 = vmul.f32 %v1340_v48, %v1450_v6  ;;  %v678_v44 = vmul.f32 %v1339_v41, %v1450_v6  ;;  %749 = sbr.rel (%p1023_p6) target bundleno = 272 (0x110), region = 36  ;;  %v1097_v6 = vpack.c.bf16 (!%p1023_p6), %v751_v58, %v750_v50  ;;  %v867_v40 = vmul.f32 (!%p1023_p6), %v750_v50, %v750_v50 }
  0xe3   : > { %v722_v52 = vadd.f32 %v706_v38, %v690_v19  ;;  %v723_v33 = vadd.f32 %v707_v18, %v691_v47  ;;  %v868_v39 = vmul.f32 (!%p1023_p6), %v751_v58, %v751_v58  ;;  %v1112_v13 = vpack.c.bf16 (!%p1023_p6), %v757_v10, %v756_v61 }
  0xe4   : > { %v694_v32 = vadd.f32 %v678_v44, %v594_v42  ;;  %v695_v49 = vadd.f32 %v679_v43, %v595_v27  ;;  %v752_v59 = vld [vmem:[#allocation2 + $0x10] sm:$0xff] (!%p1023_p6)  ;;  %v753_v55 = vld [vmem:[#allocation2 + $0x18] sm:$0xff] (!%p1023_p6)  ;;  %1098 = vst [vmem:[%s1604_s2] sm:$0xff] (!%p1023_p6), %v1097_v6   ;;  %v873_v62 = vmul.f32 (!%p1023_p6), %v756_v61, %v756_v61  ;;  %v874_v31 = vmul.f32 (!%p1023_p6), %v757_v10, %v757_v10 }
  0xe5   : > { %738 = vst [vmem:[#allocation2 + $0x40] sm:$0xff] %v722_v52  ;;  %739 = vst [vmem:[#allocation2 + $0x48] sm:$0xff] %v723_v33  ;;  %v1102_v2 = vpack.c.bf16 (!%p1023_p6), %v753_v55, %v752_v59  ;;  %v869_v60 = vmul.f32 (!%p1023_p6), %v752_v59, %v752_v59  ;;  %v883_v57 = vadd.f32 (!%p1023_p6), %v868_v39, %v867_v40  ;;  %v760_v17 = vld [vmem:[#allocation2 + $0x50] sm:$0xff] (!%p1023_p6)  ;;  %v761_v0 = vld [vmem:[#allocation2 + $0x58] sm:$0xff] (!%p1023_p6) }
  0xe6   : > { %v726_v28 = vadd.f32 %v710_v46, %v694_v32  ;;  %v727_v24 = vadd.f32 %v711_v51, %v695_v49  ;;  %v847_v4 = vadd.f32 (!%p1023_p6), %v846_v54, %v752_v59  ;;  %v870_v9 = vmul.f32 (!%p1023_p6), %v753_v55, %v753_v55  ;;  %1143 = vst [vmem:[%s1604_s2 + $0x18] sm:$0xff] (!%p1023_p6), %v1112_v13  }
  0xe7   : > { %v754_v56 = vld [vmem:[#allocation2 + $0x20] sm:$0xff] (!%p1023_p6)  ;;  %v755_v1 = vld [vmem:[#allocation2 + $0x28] sm:$0xff] (!%p1023_p6)  ;;  %1141 = vst [vmem:[%s1604_s2 + $0x8] sm:$0xff] (!%p1023_p6), %v1102_v2   ;;  %v884_v45 = vadd.f32 (!%p1023_p6), %v883_v57, %v869_v60  ;;  %v1122_v23 = vpack.c.bf16 (!%p1023_p6), %v761_v0, %v760_v17  ;;  %v877_v42 = vmul.f32 (!%p1023_p6), %v760_v17, %v760_v17  ;;  %v878_v44 = vmul.f32 (!%p1023_p6), %v761_v0, %v761_v0 }
  0xe8   : > { %742 = vst [vmem:[#allocation2 + $0x60] sm:$0xff] %v726_v28  ;;  %743 = vst [vmem:[#allocation2 + $0x68] sm:$0xff] %v727_v24  ;;  %v1107_v3 = vpack.c.bf16 (!%p1023_p6), %v755_v1, %v754_v56  ;;  %v848_v20 = vadd.f32 (!%p1023_p6), %v847_v4, %v753_v55  ;;  %v871_v21 = vmul.f32 (!%p1023_p6), %v754_v56, %v754_v56  ;;  %v764_v25 = vld [vmem:[#allocation2 + $0x70] sm:$0xff] (!%p1023_p6)  ;;  %v765_v26 = vld [vmem:[#allocation2 + $0x78] sm:$0xff] (!%p1023_p6) }
  0xe9   : > { %v885_v8 = vadd.f32 %v884_v45, %v870_v9  ;;  %v872_v29 = vmul.f32 %v755_v1, %v755_v1  ;;  %1145 = vst [vmem:[%s1604_s2 + $0x28] sm:$0xff] %v1122_v23   ;;  %v1132_v34 = vpack.c.bf16 %v765_v26, %v764_v25  ;;  %v881_v50 = vmul.f32 %v764_v25, %v764_v25 }
  0xea   : > { %1142 = vst [vmem:[%s1604_s2 + $0x10] sm:$0xff] %v1107_v3   ;;  %v849_v7 = vadd.f32 %v848_v20, %v754_v56  ;;  %v882_v53 = vmul.f32 %v765_v26, %v765_v26 }
  0xeb   : > { %v886_v63 = vadd.f32 %v885_v8, %v871_v21  ;;  %1147 = vst [vmem:[%s1604_s2 + $0x38] sm:$0xff] %v1132_v34  }
  0xec   : > { %v758_v11 = vld [vmem:[#allocation2 + $0x40] sm:$0xff]  ;;  %v759_v12 = vld [vmem:[#allocation2 + $0x48] sm:$0xff]  ;;  %v850_v35 = vadd.f32 %v849_v7, %v755_v1 }
  0xed   : > { %v1117_v14 = vpack.c.bf16 %v759_v12, %v758_v11  ;;  %v887_v22 = vadd.f32 %v886_v63, %v872_v29  ;;  %v875_v38 = vmul.f32 %v758_v11, %v758_v11  ;;  %v876_v41 = vmul.f32 %v759_v12, %v759_v12 }
  0xee   : > { %v851_v5 = vadd.f32 %v850_v35, %v756_v61 }
  0xef   : > { %v762_v15 = vld [vmem:[#allocation2 + $0x60] sm:$0xff]  ;;  %v763_v16 = vld [vmem:[#allocation2 + $0x68] sm:$0xff]  ;;  %1144 = vst [vmem:[%s1604_s2 + $0x20] sm:$0xff] %v1117_v14   ;;  %v888_v37 = vadd.f32 %v887_v22, %v873_v62 }
  0xf0   : > { %v1127_v30 = vpack.c.bf16 %v763_v16, %v762_v15  ;;  %v852_v36 = vadd.f32 %v851_v5, %v757_v10  ;;  %v879_v46 = vmul.f32 %v762_v15, %v762_v15  ;;  %v880_v49 = vmul.f32 %v763_v16, %v763_v16 }
  0xf1   : > { %v889_v18 = vadd.f32 %v888_v37, %v874_v31 }
  0xf2   : > { %1146 = vst [vmem:[%s1604_s2 + $0x30] sm:$0xff] %v1127_v30   ;;  %v853_v48 = vadd.f32 %v852_v36, %v758_v11 }
  0xf3   : > { %v890_v47 = vadd.f32 %v889_v18, %v875_v38 }
  0xf4   : > { %v854_v19 = vadd.f32 %v853_v48, %v759_v12 }
  0xf5   : > { %v891_v27 = vadd.f32 %v890_v47, %v876_v41 }
  0xf6   : > { %v855_v43 = vadd.f32 %v854_v19, %v760_v17 }
  0xf7   : > { %v892_v33 = vadd.f32 %v891_v27, %v877_v42 }
  0xf8   : > { %v856_v52 = vadd.f32 %v855_v43, %v761_v0 }
  0xf9   : > { %v893_v51 = vadd.f32 %v892_v33, %v878_v44 }
  0xfa   : > { %v857_v32 = vadd.f32 %v856_v52, %v762_v15 }
  0xfb   : > { %v894_v24 = vadd.f32 %v893_v51, %v879_v46 }
  0xfc   : > { %v858_v28 = vadd.f32 %v857_v32, %v763_v16 }
  0xfd   : > { %v895_v58 = vadd.f32 %v894_v24, %v880_v49 }
  0xfe   : > { %v859_v59 = vadd.f32 %v858_v28, %v764_v25 }
  0xff   : > { %v896_v54 = vadd.f32 %v895_v58, %v881_v50 }
 0x100   : > { %v860_v6 = vadd.f32 %v859_v59, %v765_v26 }
 0x101   : > { %v897_v39 = vadd.f32 %v896_v54, %v882_v53 }
 0x102   : > { %v861_v40 = vrot.slane %v860_v6, 4 }
 0x103   : > { %v898_v56 = vrot.slane %v897_v39, 4 }
 0x104   : > { %v862_v55 = vadd.f32 %v861_v40, %v860_v6 }
 0x105   : > { %v899_v2 = vadd.f32 %v898_v56, %v897_v39 }
 0x106   : > { %v863_v1 = vrot.slane %v862_v55, 2 }
 0x107   : > { %v900_v3 = vrot.slane %v899_v2, 2 }
 0x108   : > { %v864_v60 = vadd.f32 %v863_v1, %v862_v55 }
 0x109   : > { %v901_v57 = vadd.f32 %v900_v3, %v899_v2 }
 0x10a   : > { %v865_v61 = vrot.slane %v864_v60, 1 }
 0x10b   : > { %v902_v9 = vrot.slane %v901_v57, 1 }
 0x10c   : > { %v866_v4 = vadd.f32 %v865_v61, %v864_v60 }
 0x10d   : > { %v903_v10 = vadd.f32 %v902_v9, %v901_v57 }
 0x10e   : > { %905 = vst [vmem:[%s1605_s3] sm:$0x1] %v866_v4 }
 0x10f   : > { %906 = vst [vmem:[%s1605_s3 + $0x1] sm:$0x1] %v903_v10 }
 0x110 PF: > { %s14_s14 = sadd.s32 1, %s1368_s14   ;;  %s1606_s12 = smov %s1364_s13 }
 0x111   : > { %p11_p7 = scmp.ge.s32.totalorder %s14_s14, 11   ;;  %s1607_s13 = smov %s1609_s15 }
 0x113   :  { %13 = sbr.rel (!%p11_p7) target bundleno = 2 (0x2), region = 81 }

</bundles_post_ra>
